<compile_context>
chip_gen: v7x
topology: tpu7x:2x2x1
jax: 0.10.0
libtpu: 0.0.40
codegen_flags: <defaults>
</compile_context>

<pallas_src>
import functools

import jax
import jax.numpy as jnp
from jax import lax
from jax.experimental import pallas as pl
from jax.experimental.pallas import tpu as pltpu

EPS = 1e-5  # nn.BatchNorm2d default eps


# ----------------------------- kernel helpers --------------------------------
def _shift_lanes(v, s):
  """Circular lane shift: out[:, p] = v[:, (p + s) mod L] for static int s."""
  L = v.shape[-1]
  s = s % L
  if s == 0:
    return v
  # Equivalent to pltpu.roll(v, -s, axis=-1); two lane slices + concat on a
  # 2-vreg value, negligible either way.
  return jnp.concatenate([v[:, s:], v[:, :s]], axis=-1)


def _conv3x3(xf, w_ref, b_ref, row_ok, col_ok, W):
  """3x3 SAME conv with channels/batch on sublanes, H*W on lanes.

  xf     : (N*C, H*W) f32 activation, one (n, c) image plane per sublane row.
  w_ref  : (9, N*C, N*C) f32 per-tap block-diagonal weights (kron(I_N, W_t)).
  b_ref  : (N*C, 1) f32 conv bias tiled over the batch copies.
  row_ok / col_ok : dicts dy/dx -> (1, H*W) bool validity masks.
  Returns (N*C, H*W) f32.
  """
  acc = None
  t = 0
  for dy in (-1, 0, 1):
    for dx in (-1, 0, 1):
      v = _shift_lanes(xf, dy * W + dx)
      cond = None
      if dy != 0:
        cond = row_ok[dy]
      if dx != 0:
        cond = col_ok[dx] if cond is None else jnp.logical_and(cond, col_ok[dx])
      if cond is not None:
        v = jnp.where(cond, v, 0.0)          # zero-padding semantics
      tap = jnp.dot(w_ref[t], v, preferred_element_type=jnp.float32)
      acc = tap if acc is None else acc + tap
      t += 1
  return acc + b_ref[...]


def _batchnorm(y, g_ref, be_ref, N, C):
  """Training-mode BatchNorm over (N, H, W) per channel; two-pass, biased var."""
  # TODO(synk): running_mean/running_var buffer updates (training-time side
  # effects of nn.BatchNorm2d) are not produced; only the activation is.
  HW = y.shape[-1]
  inv = 1.0 / (N * HW)

  def per_channel_rows(rows):
    # rows: (N*C, 1) per-plane lane sums -> per-row per-channel mean (N*C, 1).
    per_c = rows[0:C, :]
    for n in range(1, N):
      per_c = per_c + rows[n * C:(n + 1) * C, :]
    per_c = per_c * inv
    return jnp.concatenate([per_c] * N, axis=0) if N > 1 else per_c

  mean = per_channel_rows(jnp.sum(y, axis=1, keepdims=True))
  cen = y - mean
  var = per_channel_rows(jnp.sum(cen * cen, axis=1, keepdims=True))
  scale = g_ref[...] * lax.rsqrt(var + EPS)            # (N*C, 1)
  return cen * scale + be_ref[...]


# --------------------------------- kernel -------------------------------------
def _residual_block_kernel(x_ref, w1_ref, b1_ref, g1_ref, be1_ref,
                           w2_ref, b2_ref, g2_ref, be2_ref, o_ref,
                           *, N, C, H, W):
  """Fused conv-BN-ReLU-conv-BN-add-ReLU; all intermediates stay in vregs."""
  x = x_ref[...]                                        # (N*C, H*W)

  # 3x3 tap validity masks on the flattened spatial (lane) axis, built once.
  pos = lax.broadcasted_iota(jnp.int32, (1, H * W), 1)
  if (W & (W - 1)) == 0:
    xx = jnp.bitwise_and(pos, W - 1)                    # column index (W power of 2)
  else:
    xx = lax.rem(pos, W)
  row_ok = {-1: pos >= W, 1: pos < (H - 1) * W}
  col_ok = {-1: xx >= 1, 1: xx <= W - 2}

  # Stage 1: conv1 -> BN1 (batch stats) -> ReLU.
  y = _conv3x3(x, w1_ref, b1_ref, row_ok, col_ok, W)
  y = jnp.maximum(_batchnorm(y, g1_ref, be1_ref, N, C), 0.0)

  # Stage 2: conv2 -> BN2 -> identity residual -> ReLU.
  y = _conv3x3(y, w2_ref, b2_ref, row_ok, col_ok, W)
  y = _batchnorm(y, g2_ref, be2_ref, N, C)
  o_ref[...] = jnp.maximum(y + x, 0.0)


# -------------------------------- wrappers ------------------------------------
def _full_spec(shape):
  # Block == whole array (last two block dims equal the full array dims).
  return pl.BlockSpec(shape, lambda i: (0,) * len(shape))


def residual_block_nchw(x_nchw, params):
  """Fused residual block on an NCHW f32 input. params from prepare_params()."""
  N, C, H, W = x_nchw.shape
  w1, b1, g1, be1, w2, b2, g2, be2 = params
  x2d = x_nchw.reshape(N * C, H * W)     # free: collapses trailing dims only
  kernel = functools.partial(_residual_block_kernel, N=N, C=C, H=H, W=W)
  args = (x2d, w1, b1, g1, be1, w2, b2, g2, be2)
  out2d = pl.pallas_call(
      kernel,
      grid=(1,),
      in_specs=[_full_spec(a.shape) for a in args],
      out_specs=_full_spec((N * C, H * W)),
      out_shape=jax.ShapeDtypeStruct((N * C, H * W), jnp.float32),
      compiler_params=pltpu.CompilerParams(
          dimension_semantics=("arbitrary",)),
  )(*args)
  return out2d.reshape(N, C, H, W)


def prepare_params(batch, w1_hwio, b1, g1, be1, w2_hwio, b2, g2, be2):
  """Fold module parameters into the kernel layout.

  Conv weights (HWIO) become per-tap (Cout, Cin) matrices block-diagonalised
  over the batch (kron(I_N, W_t)) so a single (N*C, N*C) @ (N*C, H*W) dot
  handles all images.  Conv biases and BN affine params are tiled to per-row
  (N*C, 1) columns so the kernel applies them as plain broadcasts.
  """
  eye = jnp.eye(batch, dtype=jnp.float32)

  def conv_w(w_hwio):
    kh, kw, _, _ = w_hwio.shape
    taps = []
    for ky in range(kh):
      for kx in range(kw):
        wt = jnp.transpose(w_hwio[ky, kx]).astype(jnp.float32)   # (Cout, Cin)
        taps.append(jnp.kron(eye, wt))                           # (N*C, N*C)
    return jnp.stack(taps, axis=0)                               # (9, N*C, N*C)

  def per_row(v):                                                # (C,) -> (N*C, 1)
    return jnp.tile(v.reshape(-1, 1).astype(jnp.float32), (batch, 1))

  return (conv_w(w1_hwio), per_row(b1), per_row(g1), per_row(be1),
          conv_w(w2_hwio), per_row(b2), per_row(g2), per_row(be2))


# ----------------------------- reference (pure JAX) ----------------------------
def _ref_conv(x_nhwc, w_hwio, b):
  y = lax.conv_general_dilated(
      x_nhwc, w_hwio, window_strides=(1, 1), padding="SAME",
      dimension_numbers=("NHWC", "HWIO", "NHWC"),
      precision=lax.Precision.HIGHEST)
  return y + b.reshape(1, 1, 1, -1)


def _ref_bn(y, g, be):
  mean = jnp.mean(y, axis=(0, 1, 2), keepdims=True)
  var = jnp.mean(jnp.square(y - mean), axis=(0, 1, 2), keepdims=True)
  return (y - mean) * lax.rsqrt(var + EPS) * g.reshape(1, 1, 1, -1) \
      + be.reshape(1, 1, 1, -1)


def residual_block_ref_nhwc(x, w1, b1, g1, be1, w2, b2, g2, be2):
  y = jnp.maximum(_ref_bn(_ref_conv(x, w1, b1), g1, be1), 0.0)
  y = _ref_bn(_ref_conv(y, w2, b2), g2, be2)
  return jnp.maximum(y + x, 0.0)


# ------------------------------------ main -------------------------------------
if __name__ == "__main__":
  # skip_connection=None in the module => identity residual (requires
  # in_channels == out_channels and stride == 1).
  N, C, H, W = 2, 4, 16, 16

  key = jax.random.PRNGKey(0)
  ks = jax.random.split(key, 9)
  x_nchw = jax.random.normal(ks[0], (N, C, H, W), jnp.float32)

  # Deterministic synthetic parameters (shapes follow the module's __init__).
  w1_hwio = 0.1 * jax.random.normal(ks[1], (3, 3, C, C), jnp.float32)
  b1 = 0.1 * jax.random.normal(ks[2], (C,), jnp.float32)
  g1 = 1.0 + 0.1 * jax.random.normal(ks[3], (C,), jnp.float32)
  be1 = 0.1 * jax.random.normal(ks[4], (C,), jnp.float32)
  w2_hwio = 0.1 * jax.random.normal(ks[5], (3, 3, C, C), jnp.float32)
  b2 = 0.1 * jax.random.normal(ks[6], (C,), jnp.float32)
  g2 = 1.0 + 0.1 * jax.random.normal(ks[7], (C,), jnp.float32)
  be2 = 0.1 * jax.random.normal(ks[8], (C,), jnp.float32)

  params = prepare_params(N, w1_hwio, b1, g1, be1, w2_hwio, b2, g2, be2)

  out = jax.jit(residual_block_nchw)(x_nchw, params)
  out = jax.block_until_ready(out)
  assert out.shape == (N, C, H, W)

  # Correctness vs. exact f32 module semantics (conv + bias, training-mode BN).
  x_nhwc = jnp.transpose(x_nchw, (0, 2, 3, 1))
  ref_nhwc = residual_block_ref_nhwc(x_nhwc, w1_hwio, b1, g1, be1,
                                     w2_hwio, b2, g2, be2)
  ref_nchw = jnp.transpose(ref_nhwc, (0, 3, 1, 2))
  err = float(jnp.max(jnp.abs(out - ref_nchw)))
  assert err < 2e-2, f"mismatch vs f32 reference: {err}"

  print("KERNEL_OK")
</pallas_src>

<mosaic_0001>
module attributes {stable_mosaic.version = 11 : i64} {
  func.func @_residual_block_kernel(%arg0: i32, %arg1: memref<8x256xf32, #tpu.memory_space<vmem>>, %arg2: memref<9x8x8xf32, #tpu.memory_space<vmem>>, %arg3: memref<8x1xf32, #tpu.memory_space<vmem>>, %arg4: memref<8x1xf32, #tpu.memory_space<vmem>>, %arg5: memref<8x1xf32, #tpu.memory_space<vmem>>, %arg6: memref<9x8x8xf32, #tpu.memory_space<vmem>>, %arg7: memref<8x1xf32, #tpu.memory_space<vmem>>, %arg8: memref<8x1xf32, #tpu.memory_space<vmem>>, %arg9: memref<8x1xf32, #tpu.memory_space<vmem>>, %arg10: memref<8x256xf32, #tpu.memory_space<vmem>>) attributes {dimension_semantics = [#tpu.dimension_semantics<arbitrary>], iteration_bounds = array<i64: 1>, scalar_prefetch = 0 : i64, scratch_operands = 0 : i64, tpu.core_type = #tpu.core_type<tc>, window_params = [{pipeline_mode = #tpu.pipeline_mode<synchronous>, transform_indices = @transform_0, window_bounds = array<i64: 8, 256>}, {pipeline_mode = #tpu.pipeline_mode<synchronous>, transform_indices = @transform_1, window_bounds = array<i64: 9, 8, 8>}, {pipeline_mode = #tpu.pipeline_mode<synchronous>, transform_indices = @transform_2, window_bounds = array<i64: 8, 1>}, {pipeline_mode = #tpu.pipeline_mode<synchronous>, transform_indices = @transform_3, window_bounds = array<i64: 8, 1>}, {pipeline_mode = #tpu.pipeline_mode<synchronous>, transform_indices = @transform_4, window_bounds = array<i64: 8, 1>}, {pipeline_mode = #tpu.pipeline_mode<synchronous>, transform_indices = @transform_5, window_bounds = array<i64: 9, 8, 8>}, {pipeline_mode = #tpu.pipeline_mode<synchronous>, transform_indices = @transform_6, window_bounds = array<i64: 8, 1>}, {pipeline_mode = #tpu.pipeline_mode<synchronous>, transform_indices = @transform_7, window_bounds = array<i64: 8, 1>}, {pipeline_mode = #tpu.pipeline_mode<synchronous>, transform_indices = @transform_8, window_bounds = array<i64: 8, 1>}, {pipeline_mode = #tpu.pipeline_mode<synchronous>, transform_indices = @transform_9, window_bounds = array<i64: 8, 256>}]} {
    %c0 = arith.constant 0 : index
    %c0_0 = arith.constant 0 : index
    %0 = vector.load %arg1[%c0, %c0_0] : memref<8x256xf32, #tpu.memory_space<vmem>>, vector<8x256xf32>
    %1 = tpu.iota {dimensions = array<i32: 1>} : vector<1x256xi32>
    %c15_i32 = arith.constant 15 : i32
    %2 = vector.broadcast %c15_i32 : i32 to vector<1x256xi32>
    %3 = arith.andi %1, %2 : vector<1x256xi32>
    %c16_i32 = arith.constant 16 : i32
    %4 = vector.broadcast %c16_i32 : i32 to vector<1x256xi32>
    %5 = arith.cmpi sge, %1, %4 : vector<1x256xi32>
    %c240_i32 = arith.constant 240 : i32
    %6 = vector.broadcast %c240_i32 : i32 to vector<1x256xi32>
    %7 = arith.cmpi slt, %1, %6 : vector<1x256xi32>
    %c1_i32 = arith.constant 1 : i32
    %8 = vector.broadcast %c1_i32 : i32 to vector<1x256xi32>
    %9 = arith.cmpi sge, %3, %8 : vector<1x256xi32>
    %c14_i32 = arith.constant 14 : i32
    %10 = vector.broadcast %c14_i32 : i32 to vector<1x256xi32>
    %11 = arith.cmpi sle, %3, %10 : vector<1x256xi32>
    %12 = vector.extract_strided_slice %0 {offsets = [0, 239], sizes = [8, 17], strides = [1, 1]} : vector<8x256xf32> to vector<8x17xf32>
    %13 = vector.extract_strided_slice %0 {offsets = [0, 0], sizes = [8, 239], strides = [1, 1]} : vector<8x256xf32> to vector<8x239xf32>
    %14 = tpu.concatenate %12, %13 in 1 : vector<8x17xf32>, vector<8x239xf32> -> vector<8x256xf32>
    %15 = arith.andi %5, %9 : vector<1x256xi1>
    %cst = arith.constant 0.000000e+00 : f32
    %16 = vector.shape_cast %15 : vector<1x256xi1> to vector<1x256xi1>
    %17 = vector.broadcast %16 : vector<1x256xi1> to vector<8x256xi1>
    %18 = vector.broadcast %cst : f32 to vector<8x256xf32>
    %19 = arith.select %17, %14, %18 : vector<8x256xi1>, vector<8x256xf32>
    %c0_1 = arith.constant 0 : index
    %c0_2 = arith.constant 0 : index
    %c0_3 = arith.constant 0 : index
    %20 = vector.load %arg2[%c0_1, %c0_2, %c0_3] : memref<9x8x8xf32, #tpu.memory_space<vmem>>, vector<1x8x8xf32>
    %21 = vector.shape_cast %20 : vector<1x8x8xf32> to vector<8x8xf32>
    %cst_4 = arith.constant dense<0.000000e+00> : vector<8x256xf32>
    %22 = tpu.matmul %21, %19, %cst_4 {dimension_numbers = #tpu.dot_dimension_numbers<[1], [0], [0], [1], [0, 0, 1, 1], [], []>} : vector<8x8xf32>, vector<8x256xf32>, vector<8x256xf32> -> vector<8x256xf32>
    %23 = vector.extract_strided_slice %0 {offsets = [0, 240], sizes = [8, 16], strides = [1, 1]} : vector<8x256xf32> to vector<8x16xf32>
    %24 = vector.extract_strided_slice %0 {offsets = [0, 0], sizes = [8, 240], strides = [1, 1]} : vector<8x256xf32> to vector<8x240xf32>
    %25 = tpu.concatenate %23, %24 in 1 : vector<8x16xf32>, vector<8x240xf32> -> vector<8x256xf32>
    %cst_5 = arith.constant 0.000000e+00 : f32
    %26 = vector.shape_cast %5 : vector<1x256xi1> to vector<1x256xi1>
    %27 = vector.broadcast %26 : vector<1x256xi1> to vector<8x256xi1>
    %28 = vector.broadcast %cst_5 : f32 to vector<8x256xf32>
    %29 = arith.select %27, %25, %28 : vector<8x256xi1>, vector<8x256xf32>
    %c1 = arith.constant 1 : index
    %c0_6 = arith.constant 0 : index
    %c0_7 = arith.constant 0 : index
    %30 = vector.load %arg2[%c1, %c0_6, %c0_7] : memref<9x8x8xf32, #tpu.memory_space<vmem>>, vector<1x8x8xf32>
    %31 = vector.shape_cast %30 : vector<1x8x8xf32> to vector<8x8xf32>
    %cst_8 = arith.constant dense<0.000000e+00> : vector<8x256xf32>
    %32 = tpu.matmul %31, %29, %cst_8 {dimension_numbers = #tpu.dot_dimension_numbers<[1], [0], [0], [1], [0, 0, 1, 1], [], []>} : vector<8x8xf32>, vector<8x256xf32>, vector<8x256xf32> -> vector<8x256xf32>
    %33 = arith.addf %22, %32 : vector<8x256xf32>
    %34 = vector.extract_strided_slice %0 {offsets = [0, 241], sizes = [8, 15], strides = [1, 1]} : vector<8x256xf32> to vector<8x15xf32>
    %35 = vector.extract_strided_slice %0 {offsets = [0, 0], sizes = [8, 241], strides = [1, 1]} : vector<8x256xf32> to vector<8x241xf32>
    %36 = tpu.concatenate %34, %35 in 1 : vector<8x15xf32>, vector<8x241xf32> -> vector<8x256xf32>
    %37 = arith.andi %5, %11 : vector<1x256xi1>
    %cst_9 = arith.constant 0.000000e+00 : f32
    %38 = vector.shape_cast %37 : vector<1x256xi1> to vector<1x256xi1>
    %39 = vector.broadcast %38 : vector<1x256xi1> to vector<8x256xi1>
    %40 = vector.broadcast %cst_9 : f32 to vector<8x256xf32>
    %41 = arith.select %39, %36, %40 : vector<8x256xi1>, vector<8x256xf32>
    %c2 = arith.constant 2 : index
    %c0_10 = arith.constant 0 : index
    %c0_11 = arith.constant 0 : index
    %42 = vector.load %arg2[%c2, %c0_10, %c0_11] : memref<9x8x8xf32, #tpu.memory_space<vmem>>, vector<1x8x8xf32>
    %43 = vector.shape_cast %42 : vector<1x8x8xf32> to vector<8x8xf32>
    %cst_12 = arith.constant dense<0.000000e+00> : vector<8x256xf32>
    %44 = tpu.matmul %43, %41, %cst_12 {dimension_numbers = #tpu.dot_dimension_numbers<[1], [0], [0], [1], [0, 0, 1, 1], [], []>} : vector<8x8xf32>, vector<8x256xf32>, vector<8x256xf32> -> vector<8x256xf32>
    %45 = arith.addf %33, %44 : vector<8x256xf32>
    %46 = vector.extract_strided_slice %0 {offsets = [0, 255], sizes = [8, 1], strides = [1, 1]} : vector<8x256xf32> to vector<8x1xf32>
    %47 = vector.extract_strided_slice %0 {offsets = [0, 0], sizes = [8, 255], strides = [1, 1]} : vector<8x256xf32> to vector<8x255xf32>
    %48 = tpu.concatenate %46, %47 in 1 : vector<8x1xf32>, vector<8x255xf32> -> vector<8x256xf32>
    %cst_13 = arith.constant 0.000000e+00 : f32
    %49 = vector.shape_cast %9 : vector<1x256xi1> to vector<1x256xi1>
    %50 = vector.broadcast %49 : vector<1x256xi1> to vector<8x256xi1>
    %51 = vector.broadcast %cst_13 : f32 to vector<8x256xf32>
    %52 = arith.select %50, %48, %51 : vector<8x256xi1>, vector<8x256xf32>
    %c3 = arith.constant 3 : index
    %c0_14 = arith.constant 0 : index
    %c0_15 = arith.constant 0 : index
    %53 = vector.load %arg2[%c3, %c0_14, %c0_15] : memref<9x8x8xf32, #tpu.memory_space<vmem>>, vector<1x8x8xf32>
    %54 = vector.shape_cast %53 : vector<1x8x8xf32> to vector<8x8xf32>
    %cst_16 = arith.constant dense<0.000000e+00> : vector<8x256xf32>
    %55 = tpu.matmul %54, %52, %cst_16 {dimension_numbers = #tpu.dot_dimension_numbers<[1], [0], [0], [1], [0, 0, 1, 1], [], []>} : vector<8x8xf32>, vector<8x256xf32>, vector<8x256xf32> -> vector<8x256xf32>
    %56 = arith.addf %45, %55 : vector<8x256xf32>
    %c4 = arith.constant 4 : index
    %c0_17 = arith.constant 0 : index
    %c0_18 = arith.constant 0 : index
    %57 = vector.load %arg2[%c4, %c0_17, %c0_18] : memref<9x8x8xf32, #tpu.memory_space<vmem>>, vector<1x8x8xf32>
    %58 = vector.shape_cast %57 : vector<1x8x8xf32> to vector<8x8xf32>
    %cst_19 = arith.constant dense<0.000000e+00> : vector<8x256xf32>
    %59 = tpu.matmul %58, %0, %cst_19 {dimension_numbers = #tpu.dot_dimension_numbers<[1], [0], [0], [1], [0, 0, 1, 1], [], []>} : vector<8x8xf32>, vector<8x256xf32>, vector<8x256xf32> -> vector<8x256xf32>
    %60 = arith.addf %56, %59 : vector<8x256xf32>
    %61 = vector.extract_strided_slice %0 {offsets = [0, 1], sizes = [8, 255], strides = [1, 1]} : vector<8x256xf32> to vector<8x255xf32>
    %62 = vector.extract_strided_slice %0 {offsets = [0, 0], sizes = [8, 1], strides = [1, 1]} : vector<8x256xf32> to vector<8x1xf32>
    %63 = tpu.concatenate %61, %62 in 1 : vector<8x255xf32>, vector<8x1xf32> -> vector<8x256xf32>
    %cst_20 = arith.constant 0.000000e+00 : f32
    %64 = vector.shape_cast %11 : vector<1x256xi1> to vector<1x256xi1>
    %65 = vector.broadcast %64 : vector<1x256xi1> to vector<8x256xi1>
    %66 = vector.broadcast %cst_20 : f32 to vector<8x256xf32>
    %67 = arith.select %65, %63, %66 : vector<8x256xi1>, vector<8x256xf32>
    %c5 = arith.constant 5 : index
    %c0_21 = arith.constant 0 : index
    %c0_22 = arith.constant 0 : index
    %68 = vector.load %arg2[%c5, %c0_21, %c0_22] : memref<9x8x8xf32, #tpu.memory_space<vmem>>, vector<1x8x8xf32>
    %69 = vector.shape_cast %68 : vector<1x8x8xf32> to vector<8x8xf32>
    %cst_23 = arith.constant dense<0.000000e+00> : vector<8x256xf32>
    %70 = tpu.matmul %69, %67, %cst_23 {dimension_numbers = #tpu.dot_dimension_numbers<[1], [0], [0], [1], [0, 0, 1, 1], [], []>} : vector<8x8xf32>, vector<8x256xf32>, vector<8x256xf32> -> vector<8x256xf32>
    %71 = arith.addf %60, %70 : vector<8x256xf32>
    %72 = vector.extract_strided_slice %0 {offsets = [0, 15], sizes = [8, 241], strides = [1, 1]} : vector<8x256xf32> to vector<8x241xf32>
    %73 = vector.extract_strided_slice %0 {offsets = [0, 0], sizes = [8, 15], strides = [1, 1]} : vector<8x256xf32> to vector<8x15xf32>
    %74 = tpu.concatenate %72, %73 in 1 : vector<8x241xf32>, vector<8x15xf32> -> vector<8x256xf32>
    %75 = arith.andi %7, %9 : vector<1x256xi1>
    %cst_24 = arith.constant 0.000000e+00 : f32
    %76 = vector.shape_cast %75 : vector<1x256xi1> to vector<1x256xi1>
    %77 = vector.broadcast %76 : vector<1x256xi1> to vector<8x256xi1>
    %78 = vector.broadcast %cst_24 : f32 to vector<8x256xf32>
    %79 = arith.select %77, %74, %78 : vector<8x256xi1>, vector<8x256xf32>
    %c6 = arith.constant 6 : index
    %c0_25 = arith.constant 0 : index
    %c0_26 = arith.constant 0 : index
    %80 = vector.load %arg2[%c6, %c0_25, %c0_26] : memref<9x8x8xf32, #tpu.memory_space<vmem>>, vector<1x8x8xf32>
    %81 = vector.shape_cast %80 : vector<1x8x8xf32> to vector<8x8xf32>
    %cst_27 = arith.constant dense<0.000000e+00> : vector<8x256xf32>
    %82 = tpu.matmul %81, %79, %cst_27 {dimension_numbers = #tpu.dot_dimension_numbers<[1], [0], [0], [1], [0, 0, 1, 1], [], []>} : vector<8x8xf32>, vector<8x256xf32>, vector<8x256xf32> -> vector<8x256xf32>
    %83 = arith.addf %71, %82 : vector<8x256xf32>
    %84 = vector.extract_strided_slice %0 {offsets = [0, 16], sizes = [8, 240], strides = [1, 1]} : vector<8x256xf32> to vector<8x240xf32>
    %85 = vector.extract_strided_slice %0 {offsets = [0, 0], sizes = [8, 16], strides = [1, 1]} : vector<8x256xf32> to vector<8x16xf32>
    %86 = tpu.concatenate %84, %85 in 1 : vector<8x240xf32>, vector<8x16xf32> -> vector<8x256xf32>
    %cst_28 = arith.constant 0.000000e+00 : f32
    %87 = vector.shape_cast %7 : vector<1x256xi1> to vector<1x256xi1>
    %88 = vector.broadcast %87 : vector<1x256xi1> to vector<8x256xi1>
    %89 = vector.broadcast %cst_28 : f32 to vector<8x256xf32>
    %90 = arith.select %88, %86, %89 : vector<8x256xi1>, vector<8x256xf32>
    %c7 = arith.constant 7 : index
    %c0_29 = arith.constant 0 : index
    %c0_30 = arith.constant 0 : index
    %91 = vector.load %arg2[%c7, %c0_29, %c0_30] : memref<9x8x8xf32, #tpu.memory_space<vmem>>, vector<1x8x8xf32>
    %92 = vector.shape_cast %91 : vector<1x8x8xf32> to vector<8x8xf32>
    %cst_31 = arith.constant dense<0.000000e+00> : vector<8x256xf32>
    %93 = tpu.matmul %92, %90, %cst_31 {dimension_numbers = #tpu.dot_dimension_numbers<[1], [0], [0], [1], [0, 0, 1, 1], [], []>} : vector<8x8xf32>, vector<8x256xf32>, vector<8x256xf32> -> vector<8x256xf32>
    %94 = arith.addf %83, %93 : vector<8x256xf32>
    %95 = vector.extract_strided_slice %0 {offsets = [0, 17], sizes = [8, 239], strides = [1, 1]} : vector<8x256xf32> to vector<8x239xf32>
    %96 = vector.extract_strided_slice %0 {offsets = [0, 0], sizes = [8, 17], strides = [1, 1]} : vector<8x256xf32> to vector<8x17xf32>
    %97 = tpu.concatenate %95, %96 in 1 : vector<8x239xf32>, vector<8x17xf32> -> vector<8x256xf32>
    %98 = arith.andi %7, %11 : vector<1x256xi1>
    %cst_32 = arith.constant 0.000000e+00 : f32
    %99 = vector.shape_cast %98 : vector<1x256xi1> to vector<1x256xi1>
    %100 = vector.broadcast %99 : vector<1x256xi1> to vector<8x256xi1>
    %101 = vector.broadcast %cst_32 : f32 to vector<8x256xf32>
    %102 = arith.select %100, %97, %101 : vector<8x256xi1>, vector<8x256xf32>
    %c8 = arith.constant 8 : index
    %c0_33 = arith.constant 0 : index
    %c0_34 = arith.constant 0 : index
    %103 = vector.load %arg2[%c8, %c0_33, %c0_34] : memref<9x8x8xf32, #tpu.memory_space<vmem>>, vector<1x8x8xf32>
    %104 = vector.shape_cast %103 : vector<1x8x8xf32> to vector<8x8xf32>
    %cst_35 = arith.constant dense<0.000000e+00> : vector<8x256xf32>
    %105 = tpu.matmul %104, %102, %cst_35 {dimension_numbers = #tpu.dot_dimension_numbers<[1], [0], [0], [1], [0, 0, 1, 1], [], []>} : vector<8x8xf32>, vector<8x256xf32>, vector<8x256xf32> -> vector<8x256xf32>
    %106 = arith.addf %94, %105 : vector<8x256xf32>
    %c0_36 = arith.constant 0 : index
    %c0_37 = arith.constant 0 : index
    %107 = vector.load %arg3[%c0_36, %c0_37] : memref<8x1xf32, #tpu.memory_space<vmem>>, vector<8x1xf32>
    %108 = vector.broadcast %107 : vector<8x1xf32> to vector<8x256xf32>
    %109 = arith.addf %106, %108 : vector<8x256xf32>
    %cst_38 = arith.constant dense<0.000000e+00> : vector<8xf32>
    %110 = vector.multi_reduction <add>, %109, %cst_38 [1] : vector<8x256xf32> to vector<8xf32>
    %111 = vector.shape_cast %110 : vector<8xf32> to vector<8x1xf32>
    %112 = vector.extract_strided_slice %111 {offsets = [0, 0], sizes = [4, 1], strides = [1, 1]} : vector<8x1xf32> to vector<4x1xf32>
    %113 = vector.extract_strided_slice %111 {offsets = [4, 0], sizes = [4, 1], strides = [1, 1]} : vector<8x1xf32> to vector<4x1xf32>
    %114 = arith.addf %112, %113 : vector<4x1xf32>
    %cst_39 = arith.constant 0.001953125 : f32
    %115 = vector.broadcast %cst_39 : f32 to vector<4x1xf32>
    %116 = arith.mulf %114, %115 : vector<4x1xf32>
    %117 = tpu.concatenate %116, %116 in 0 : vector<4x1xf32>, vector<4x1xf32> -> vector<8x1xf32>
    %118 = vector.broadcast %117 : vector<8x1xf32> to vector<8x256xf32>
    %119 = arith.subf %109, %118 : vector<8x256xf32>
    %120 = arith.mulf %119, %119 : vector<8x256xf32>
    %cst_40 = arith.constant dense<0.000000e+00> : vector<8xf32>
    %121 = vector.multi_reduction <add>, %120, %cst_40 [1] : vector<8x256xf32> to vector<8xf32>
    %122 = vector.shape_cast %121 : vector<8xf32> to vector<8x1xf32>
    %123 = vector.extract_strided_slice %122 {offsets = [0, 0], sizes = [4, 1], strides = [1, 1]} : vector<8x1xf32> to vector<4x1xf32>
    %124 = vector.extract_strided_slice %122 {offsets = [4, 0], sizes = [4, 1], strides = [1, 1]} : vector<8x1xf32> to vector<4x1xf32>
    %125 = arith.addf %123, %124 : vector<4x1xf32>
    %cst_41 = arith.constant 0.001953125 : f32
    %126 = vector.broadcast %cst_41 : f32 to vector<4x1xf32>
    %127 = arith.mulf %125, %126 : vector<4x1xf32>
    %128 = tpu.concatenate %127, %127 in 0 : vector<4x1xf32>, vector<4x1xf32> -> vector<8x1xf32>
    %c0_42 = arith.constant 0 : index
    %c0_43 = arith.constant 0 : index
    %129 = vector.load %arg4[%c0_42, %c0_43] : memref<8x1xf32, #tpu.memory_space<vmem>>, vector<8x1xf32>
    %cst_44 = arith.constant 9.99999974E-6 : f32
    %130 = vector.broadcast %cst_44 : f32 to vector<8x1xf32>
    %131 = arith.addf %128, %130 : vector<8x1xf32>
    %132 = math.rsqrt %131 : vector<8x1xf32>
    %133 = arith.mulf %129, %132 : vector<8x1xf32>
    %134 = vector.broadcast %133 : vector<8x1xf32> to vector<8x256xf32>
    %135 = arith.mulf %119, %134 : vector<8x256xf32>
    %c0_45 = arith.constant 0 : index
    %c0_46 = arith.constant 0 : index
    %136 = vector.load %arg5[%c0_45, %c0_46] : memref<8x1xf32, #tpu.memory_space<vmem>>, vector<8x1xf32>
    %137 = vector.broadcast %136 : vector<8x1xf32> to vector<8x256xf32>
    %138 = arith.addf %135, %137 : vector<8x256xf32>
    %cst_47 = arith.constant 0.000000e+00 : f32
    %139 = vector.broadcast %cst_47 : f32 to vector<8x256xf32>
    %140 = arith.maximumf %138, %139 : vector<8x256xf32>
    %141 = vector.extract_strided_slice %140 {offsets = [0, 239], sizes = [8, 17], strides = [1, 1]} : vector<8x256xf32> to vector<8x17xf32>
    %142 = vector.extract_strided_slice %140 {offsets = [0, 0], sizes = [8, 239], strides = [1, 1]} : vector<8x256xf32> to vector<8x239xf32>
    %143 = tpu.concatenate %141, %142 in 1 : vector<8x17xf32>, vector<8x239xf32> -> vector<8x256xf32>
    %144 = arith.andi %5, %9 : vector<1x256xi1>
    %cst_48 = arith.constant 0.000000e+00 : f32
    %145 = vector.shape_cast %144 : vector<1x256xi1> to vector<1x256xi1>
    %146 = vector.broadcast %145 : vector<1x256xi1> to vector<8x256xi1>
    %147 = vector.broadcast %cst_48 : f32 to vector<8x256xf32>
    %148 = arith.select %146, %143, %147 : vector<8x256xi1>, vector<8x256xf32>
    %c0_49 = arith.constant 0 : index
    %c0_50 = arith.constant 0 : index
    %c0_51 = arith.constant 0 : index
    %149 = vector.load %arg6[%c0_49, %c0_50, %c0_51] : memref<9x8x8xf32, #tpu.memory_space<vmem>>, vector<1x8x8xf32>
    %150 = vector.shape_cast %149 : vector<1x8x8xf32> to vector<8x8xf32>
    %cst_52 = arith.constant dense<0.000000e+00> : vector<8x256xf32>
    %151 = tpu.matmul %150, %148, %cst_52 {dimension_numbers = #tpu.dot_dimension_numbers<[1], [0], [0], [1], [0, 0, 1, 1], [], []>} : vector<8x8xf32>, vector<8x256xf32>, vector<8x256xf32> -> vector<8x256xf32>
    %152 = vector.extract_strided_slice %140 {offsets = [0, 240], sizes = [8, 16], strides = [1, 1]} : vector<8x256xf32> to vector<8x16xf32>
    %153 = vector.extract_strided_slice %140 {offsets = [0, 0], sizes = [8, 240], strides = [1, 1]} : vector<8x256xf32> to vector<8x240xf32>
    %154 = tpu.concatenate %152, %153 in 1 : vector<8x16xf32>, vector<8x240xf32> -> vector<8x256xf32>
    %cst_53 = arith.constant 0.000000e+00 : f32
    %155 = vector.shape_cast %5 : vector<1x256xi1> to vector<1x256xi1>
    %156 = vector.broadcast %155 : vector<1x256xi1> to vector<8x256xi1>
    %157 = vector.broadcast %cst_53 : f32 to vector<8x256xf32>
    %158 = arith.select %156, %154, %157 : vector<8x256xi1>, vector<8x256xf32>
    %c1_54 = arith.constant 1 : index
    %c0_55 = arith.constant 0 : index
    %c0_56 = arith.constant 0 : index
    %159 = vector.load %arg6[%c1_54, %c0_55, %c0_56] : memref<9x8x8xf32, #tpu.memory_space<vmem>>, vector<1x8x8xf32>
    %160 = vector.shape_cast %159 : vector<1x8x8xf32> to vector<8x8xf32>
    %cst_57 = arith.constant dense<0.000000e+00> : vector<8x256xf32>
    %161 = tpu.matmul %160, %158, %cst_57 {dimension_numbers = #tpu.dot_dimension_numbers<[1], [0], [0], [1], [0, 0, 1, 1], [], []>} : vector<8x8xf32>, vector<8x256xf32>, vector<8x256xf32> -> vector<8x256xf32>
    %162 = arith.addf %151, %161 : vector<8x256xf32>
    %163 = vector.extract_strided_slice %140 {offsets = [0, 241], sizes = [8, 15], strides = [1, 1]} : vector<8x256xf32> to vector<8x15xf32>
    %164 = vector.extract_strided_slice %140 {offsets = [0, 0], sizes = [8, 241], strides = [1, 1]} : vector<8x256xf32> to vector<8x241xf32>
    %165 = tpu.concatenate %163, %164 in 1 : vector<8x15xf32>, vector<8x241xf32> -> vector<8x256xf32>
    %166 = arith.andi %5, %11 : vector<1x256xi1>
    %cst_58 = arith.constant 0.000000e+00 : f32
    %167 = vector.shape_cast %166 : vector<1x256xi1> to vector<1x256xi1>
    %168 = vector.broadcast %167 : vector<1x256xi1> to vector<8x256xi1>
    %169 = vector.broadcast %cst_58 : f32 to vector<8x256xf32>
    %170 = arith.select %168, %165, %169 : vector<8x256xi1>, vector<8x256xf32>
    %c2_59 = arith.constant 2 : index
    %c0_60 = arith.constant 0 : index
    %c0_61 = arith.constant 0 : index
    %171 = vector.load %arg6[%c2_59, %c0_60, %c0_61] : memref<9x8x8xf32, #tpu.memory_space<vmem>>, vector<1x8x8xf32>
    %172 = vector.shape_cast %171 : vector<1x8x8xf32> to vector<8x8xf32>
    %cst_62 = arith.constant dense<0.000000e+00> : vector<8x256xf32>
    %173 = tpu.matmul %172, %170, %cst_62 {dimension_numbers = #tpu.dot_dimension_numbers<[1], [0], [0], [1], [0, 0, 1, 1], [], []>} : vector<8x8xf32>, vector<8x256xf32>, vector<8x256xf32> -> vector<8x256xf32>
    %174 = arith.addf %162, %173 : vector<8x256xf32>
    %175 = vector.extract_strided_slice %140 {offsets = [0, 255], sizes = [8, 1], strides = [1, 1]} : vector<8x256xf32> to vector<8x1xf32>
    %176 = vector.extract_strided_slice %140 {offsets = [0, 0], sizes = [8, 255], strides = [1, 1]} : vector<8x256xf32> to vector<8x255xf32>
    %177 = tpu.concatenate %175, %176 in 1 : vector<8x1xf32>, vector<8x255xf32> -> vector<8x256xf32>
    %cst_63 = arith.constant 0.000000e+00 : f32
    %178 = vector.shape_cast %9 : vector<1x256xi1> to vector<1x256xi1>
    %179 = vector.broadcast %178 : vector<1x256xi1> to vector<8x256xi1>
    %180 = vector.broadcast %cst_63 : f32 to vector<8x256xf32>
    %181 = arith.select %179, %177, %180 : vector<8x256xi1>, vector<8x256xf32>
    %c3_64 = arith.constant 3 : index
    %c0_65 = arith.constant 0 : index
    %c0_66 = arith.constant 0 : index
    %182 = vector.load %arg6[%c3_64, %c0_65, %c0_66] : memref<9x8x8xf32, #tpu.memory_space<vmem>>, vector<1x8x8xf32>
    %183 = vector.shape_cast %182 : vector<1x8x8xf32> to vector<8x8xf32>
    %cst_67 = arith.constant dense<0.000000e+00> : vector<8x256xf32>
    %184 = tpu.matmul %183, %181, %cst_67 {dimension_numbers = #tpu.dot_dimension_numbers<[1], [0], [0], [1], [0, 0, 1, 1], [], []>} : vector<8x8xf32>, vector<8x256xf32>, vector<8x256xf32> -> vector<8x256xf32>
    %185 = arith.addf %174, %184 : vector<8x256xf32>
    %c4_68 = arith.constant 4 : index
    %c0_69 = arith.constant 0 : index
    %c0_70 = arith.constant 0 : index
    %186 = vector.load %arg6[%c4_68, %c0_69, %c0_70] : memref<9x8x8xf32, #tpu.memory_space<vmem>>, vector<1x8x8xf32>
    %187 = vector.shape_cast %186 : vector<1x8x8xf32> to vector<8x8xf32>
    %cst_71 = arith.constant dense<0.000000e+00> : vector<8x256xf32>
    %188 = tpu.matmul %187, %140, %cst_71 {dimension_numbers = #tpu.dot_dimension_numbers<[1], [0], [0], [1], [0, 0, 1, 1], [], []>} : vector<8x8xf32>, vector<8x256xf32>, vector<8x256xf32> -> vector<8x256xf32>
    %189 = arith.addf %185, %188 : vector<8x256xf32>
    %190 = vector.extract_strided_slice %140 {offsets = [0, 1], sizes = [8, 255], strides = [1, 1]} : vector<8x256xf32> to vector<8x255xf32>
    %191 = vector.extract_strided_slice %140 {offsets = [0, 0], sizes = [8, 1], strides = [1, 1]} : vector<8x256xf32> to vector<8x1xf32>
    %192 = tpu.concatenate %190, %191 in 1 : vector<8x255xf32>, vector<8x1xf32> -> vector<8x256xf32>
    %cst_72 = arith.constant 0.000000e+00 : f32
    %193 = vector.shape_cast %11 : vector<1x256xi1> to vector<1x256xi1>
    %194 = vector.broadcast %193 : vector<1x256xi1> to vector<8x256xi1>
    %195 = vector.broadcast %cst_72 : f32 to vector<8x256xf32>
    %196 = arith.select %194, %192, %195 : vector<8x256xi1>, vector<8x256xf32>
    %c5_73 = arith.constant 5 : index
    %c0_74 = arith.constant 0 : index
    %c0_75 = arith.constant 0 : index
    %197 = vector.load %arg6[%c5_73, %c0_74, %c0_75] : memref<9x8x8xf32, #tpu.memory_space<vmem>>, vector<1x8x8xf32>
    %198 = vector.shape_cast %197 : vector<1x8x8xf32> to vector<8x8xf32>
    %cst_76 = arith.constant dense<0.000000e+00> : vector<8x256xf32>
    %199 = tpu.matmul %198, %196, %cst_76 {dimension_numbers = #tpu.dot_dimension_numbers<[1], [0], [0], [1], [0, 0, 1, 1], [], []>} : vector<8x8xf32>, vector<8x256xf32>, vector<8x256xf32> -> vector<8x256xf32>
    %200 = arith.addf %189, %199 : vector<8x256xf32>
    %201 = vector.extract_strided_slice %140 {offsets = [0, 15], sizes = [8, 241], strides = [1, 1]} : vector<8x256xf32> to vector<8x241xf32>
    %202 = vector.extract_strided_slice %140 {offsets = [0, 0], sizes = [8, 15], strides = [1, 1]} : vector<8x256xf32> to vector<8x15xf32>
    %203 = tpu.concatenate %201, %202 in 1 : vector<8x241xf32>, vector<8x15xf32> -> vector<8x256xf32>
    %204 = arith.andi %7, %9 : vector<1x256xi1>
    %cst_77 = arith.constant 0.000000e+00 : f32
    %205 = vector.shape_cast %204 : vector<1x256xi1> to vector<1x256xi1>
    %206 = vector.broadcast %205 : vector<1x256xi1> to vector<8x256xi1>
    %207 = vector.broadcast %cst_77 : f32 to vector<8x256xf32>
    %208 = arith.select %206, %203, %207 : vector<8x256xi1>, vector<8x256xf32>
    %c6_78 = arith.constant 6 : index
    %c0_79 = arith.constant 0 : index
    %c0_80 = arith.constant 0 : index
    %209 = vector.load %arg6[%c6_78, %c0_79, %c0_80] : memref<9x8x8xf32, #tpu.memory_space<vmem>>, vector<1x8x8xf32>
    %210 = vector.shape_cast %209 : vector<1x8x8xf32> to vector<8x8xf32>
    %cst_81 = arith.constant dense<0.000000e+00> : vector<8x256xf32>
    %211 = tpu.matmul %210, %208, %cst_81 {dimension_numbers = #tpu.dot_dimension_numbers<[1], [0], [0], [1], [0, 0, 1, 1], [], []>} : vector<8x8xf32>, vector<8x256xf32>, vector<8x256xf32> -> vector<8x256xf32>
    %212 = arith.addf %200, %211 : vector<8x256xf32>
    %213 = vector.extract_strided_slice %140 {offsets = [0, 16], sizes = [8, 240], strides = [1, 1]} : vector<8x256xf32> to vector<8x240xf32>
    %214 = vector.extract_strided_slice %140 {offsets = [0, 0], sizes = [8, 16], strides = [1, 1]} : vector<8x256xf32> to vector<8x16xf32>
    %215 = tpu.concatenate %213, %214 in 1 : vector<8x240xf32>, vector<8x16xf32> -> vector<8x256xf32>
    %cst_82 = arith.constant 0.000000e+00 : f32
    %216 = vector.shape_cast %7 : vector<1x256xi1> to vector<1x256xi1>
    %217 = vector.broadcast %216 : vector<1x256xi1> to vector<8x256xi1>
    %218 = vector.broadcast %cst_82 : f32 to vector<8x256xf32>
    %219 = arith.select %217, %215, %218 : vector<8x256xi1>, vector<8x256xf32>
    %c7_83 = arith.constant 7 : index
    %c0_84 = arith.constant 0 : index
    %c0_85 = arith.constant 0 : index
    %220 = vector.load %arg6[%c7_83, %c0_84, %c0_85] : memref<9x8x8xf32, #tpu.memory_space<vmem>>, vector<1x8x8xf32>
    %221 = vector.shape_cast %220 : vector<1x8x8xf32> to vector<8x8xf32>
    %cst_86 = arith.constant dense<0.000000e+00> : vector<8x256xf32>
    %222 = tpu.matmul %221, %219, %cst_86 {dimension_numbers = #tpu.dot_dimension_numbers<[1], [0], [0], [1], [0, 0, 1, 1], [], []>} : vector<8x8xf32>, vector<8x256xf32>, vector<8x256xf32> -> vector<8x256xf32>
    %223 = arith.addf %212, %222 : vector<8x256xf32>
    %224 = vector.extract_strided_slice %140 {offsets = [0, 17], sizes = [8, 239], strides = [1, 1]} : vector<8x256xf32> to vector<8x239xf32>
    %225 = vector.extract_strided_slice %140 {offsets = [0, 0], sizes = [8, 17], strides = [1, 1]} : vector<8x256xf32> to vector<8x17xf32>
    %226 = tpu.concatenate %224, %225 in 1 : vector<8x239xf32>, vector<8x17xf32> -> vector<8x256xf32>
    %227 = arith.andi %7, %11 : vector<1x256xi1>
    %cst_87 = arith.constant 0.000000e+00 : f32
    %228 = vector.shape_cast %227 : vector<1x256xi1> to vector<1x256xi1>
    %229 = vector.broadcast %228 : vector<1x256xi1> to vector<8x256xi1>
    %230 = vector.broadcast %cst_87 : f32 to vector<8x256xf32>
    %231 = arith.select %229, %226, %230 : vector<8x256xi1>, vector<8x256xf32>
    %c8_88 = arith.constant 8 : index
    %c0_89 = arith.constant 0 : index
    %c0_90 = arith.constant 0 : index
    %232 = vector.load %arg6[%c8_88, %c0_89, %c0_90] : memref<9x8x8xf32, #tpu.memory_space<vmem>>, vector<1x8x8xf32>
    %233 = vector.shape_cast %232 : vector<1x8x8xf32> to vector<8x8xf32>
    %cst_91 = arith.constant dense<0.000000e+00> : vector<8x256xf32>
    %234 = tpu.matmul %233, %231, %cst_91 {dimension_numbers = #tpu.dot_dimension_numbers<[1], [0], [0], [1], [0, 0, 1, 1], [], []>} : vector<8x8xf32>, vector<8x256xf32>, vector<8x256xf32> -> vector<8x256xf32>
    %235 = arith.addf %223, %234 : vector<8x256xf32>
    %c0_92 = arith.constant 0 : index
    %c0_93 = arith.constant 0 : index
    %236 = vector.load %arg7[%c0_92, %c0_93] : memref<8x1xf32, #tpu.memory_space<vmem>>, vector<8x1xf32>
    %237 = vector.broadcast %236 : vector<8x1xf32> to vector<8x256xf32>
    %238 = arith.addf %235, %237 : vector<8x256xf32>
    %cst_94 = arith.constant dense<0.000000e+00> : vector<8xf32>
    %239 = vector.multi_reduction <add>, %238, %cst_94 [1] : vector<8x256xf32> to vector<8xf32>
    %240 = vector.shape_cast %239 : vector<8xf32> to vector<8x1xf32>
    %241 = vector.extract_strided_slice %240 {offsets = [0, 0], sizes = [4, 1], strides = [1, 1]} : vector<8x1xf32> to vector<4x1xf32>
    %242 = vector.extract_strided_slice %240 {offsets = [4, 0], sizes = [4, 1], strides = [1, 1]} : vector<8x1xf32> to vector<4x1xf32>
    %243 = arith.addf %241, %242 : vector<4x1xf32>
    %cst_95 = arith.constant 0.001953125 : f32
    %244 = vector.broadcast %cst_95 : f32 to vector<4x1xf32>
    %245 = arith.mulf %243, %244 : vector<4x1xf32>
    %246 = tpu.concatenate %245, %245 in 0 : vector<4x1xf32>, vector<4x1xf32> -> vector<8x1xf32>
    %247 = vector.broadcast %246 : vector<8x1xf32> to vector<8x256xf32>
    %248 = arith.subf %238, %247 : vector<8x256xf32>
    %249 = arith.mulf %248, %248 : vector<8x256xf32>
    %cst_96 = arith.constant dense<0.000000e+00> : vector<8xf32>
    %250 = vector.multi_reduction <add>, %249, %cst_96 [1] : vector<8x256xf32> to vector<8xf32>
    %251 = vector.shape_cast %250 : vector<8xf32> to vector<8x1xf32>
    %252 = vector.extract_strided_slice %251 {offsets = [0, 0], sizes = [4, 1], strides = [1, 1]} : vector<8x1xf32> to vector<4x1xf32>
    %253 = vector.extract_strided_slice %251 {offsets = [4, 0], sizes = [4, 1], strides = [1, 1]} : vector<8x1xf32> to vector<4x1xf32>
    %254 = arith.addf %252, %253 : vector<4x1xf32>
    %cst_97 = arith.constant 0.001953125 : f32
    %255 = vector.broadcast %cst_97 : f32 to vector<4x1xf32>
    %256 = arith.mulf %254, %255 : vector<4x1xf32>
    %257 = tpu.concatenate %256, %256 in 0 : vector<4x1xf32>, vector<4x1xf32> -> vector<8x1xf32>
    %c0_98 = arith.constant 0 : index
    %c0_99 = arith.constant 0 : index
    %258 = vector.load %arg8[%c0_98, %c0_99] : memref<8x1xf32, #tpu.memory_space<vmem>>, vector<8x1xf32>
    %cst_100 = arith.constant 9.99999974E-6 : f32
    %259 = vector.broadcast %cst_100 : f32 to vector<8x1xf32>
    %260 = arith.addf %257, %259 : vector<8x1xf32>
    %261 = math.rsqrt %260 : vector<8x1xf32>
    %262 = arith.mulf %258, %261 : vector<8x1xf32>
    %263 = vector.broadcast %262 : vector<8x1xf32> to vector<8x256xf32>
    %264 = arith.mulf %248, %263 : vector<8x256xf32>
    %c0_101 = arith.constant 0 : index
    %c0_102 = arith.constant 0 : index
    %265 = vector.load %arg9[%c0_101, %c0_102] : memref<8x1xf32, #tpu.memory_space<vmem>>, vector<8x1xf32>
    %266 = vector.broadcast %265 : vector<8x1xf32> to vector<8x256xf32>
    %267 = arith.addf %264, %266 : vector<8x256xf32>
    %268 = arith.addf %267, %0 : vector<8x256xf32>
    %cst_103 = arith.constant 0.000000e+00 : f32
    %269 = vector.broadcast %cst_103 : f32 to vector<8x256xf32>
    %270 = arith.maximumf %268, %269 : vector<8x256xf32>
    %c0_104 = arith.constant 0 : index
    %c0_105 = arith.constant 0 : index
    %271 = vector.load %arg10[%c0_104, %c0_105] : memref<8x256xf32, #tpu.memory_space<vmem>>, vector<8x256xf32>
    tpu.vector_store %arg10[%c0_104, %c0_105], %270 {strides = array<i32>} : memref<8x256xf32, #tpu.memory_space<vmem>>, vector<8x256xf32>,
    return
  }
  func.func @transform_0(%arg0: i32) -> (i32, i32) {
    %c0_i32 = arith.constant 0 : i32
    %c0_i32_0 = arith.constant 0 : i32
    %c0_i32_1 = arith.constant 0 : i32
    return %c0_i32, %c0_i32_0 : i32, i32
  }
  func.func @transform_1(%arg0: i32) -> (i32, i32, i32) {
    %c0_i32 = arith.constant 0 : i32
    %c0_i32_0 = arith.constant 0 : i32
    %c0_i32_1 = arith.constant 0 : i32
    %c0_i32_2 = arith.constant 0 : i32
    return %c0_i32, %c0_i32_0, %c0_i32_1 : i32, i32, i32
  }
  func.func @transform_2(%arg0: i32) -> (i32, i32) {
    %c0_i32 = arith.constant 0 : i32
    %c0_i32_0 = arith.constant 0 : i32
    %c0_i32_1 = arith.constant 0 : i32
    return %c0_i32, %c0_i32_0 : i32, i32
  }
  func.func @transform_3(%arg0: i32) -> (i32, i32) {
    %c0_i32 = arith.constant 0 : i32
    %c0_i32_0 = arith.constant 0 : i32
    %c0_i32_1 = arith.constant 0 : i32
    return %c0_i32, %c0_i32_0 : i32, i32
  }
  func.func @transform_4(%arg0: i32) -> (i32, i32) {
    %c0_i32 = arith.constant 0 : i32
    %c0_i32_0 = arith.constant 0 : i32
    %c0_i32_1 = arith.constant 0 : i32
    return %c0_i32, %c0_i32_0 : i32, i32
  }
  func.func @transform_5(%arg0: i32) -> (i32, i32, i32) {
    %c0_i32 = arith.constant 0 : i32
    %c0_i32_0 = arith.constant 0 : i32
    %c0_i32_1 = arith.constant 0 : i32
    %c0_i32_2 = arith.constant 0 : i32
    return %c0_i32, %c0_i32_0, %c0_i32_1 : i32, i32, i32
  }
  func.func @transform_6(%arg0: i32) -> (i32, i32) {
    %c0_i32 = arith.constant 0 : i32
    %c0_i32_0 = arith.constant 0 : i32
    %c0_i32_1 = arith.constant 0 : i32
    return %c0_i32, %c0_i32_0 : i32, i32
  }
  func.func @transform_7(%arg0: i32) -> (i32, i32) {
    %c0_i32 = arith.constant 0 : i32
    %c0_i32_0 = arith.constant 0 : i32
    %c0_i32_1 = arith.constant 0 : i32
    return %c0_i32, %c0_i32_0 : i32, i32
  }
  func.func @transform_8(%arg0: i32) -> (i32, i32) {
    %c0_i32 = arith.constant 0 : i32
    %c0_i32_0 = arith.constant 0 : i32
    %c0_i32_1 = arith.constant 0 : i32
    return %c0_i32, %c0_i32_0 : i32, i32
  }
  func.func @transform_9(%arg0: i32) -> (i32, i32) {
    %c0_i32 = arith.constant 0 : i32
    %c0_i32_0 = arith.constant 0 : i32
    %c0_i32_1 = arith.constant 0 : i32
    return %c0_i32, %c0_i32_0 : i32, i32
  }
}

</mosaic_0001>

<bundles_post_ra>
// kernel: residual_block_nchw.1
= control target key start
LH: loop header
LB: loop body
LE: loop exit
PB: predicated region body
PF: predicated region fallthrough
CT: control target
= control target key end

     0   :  { %v1913_v1 = vmov 0.0   ;;  %s1914_s11 = smov 17   ;;  %s1915_s12 = smov 16   ;;  %v1922_v3 = vmov 0   ;;  %v34_v5 = vlaneseq  ;;  %vm54_vm0 = vcmask 138240   ;;  %s2298_s0 = inlined_call_operand.vmem [shape: f32[8,256], index: 0, kind: input, shape index: {}]   ;;  %s2299_s2 = inlined_call_operand.vmem [shape: f32[8,1], index: 2, kind: input, shape index: {}]   ;;  %s2300_s1 = inlined_call_operand.vmem [shape: f32[9,8,8], index: 1, kind: input, shape index: {}]   ;;  %s2301_s4 = inlined_call_operand.vmem [shape: f32[8,1], index: 4, kind: input, shape index: {}]   ;;  %s2302_s3 = inlined_call_operand.vmem [shape: f32[8,1], index: 3, kind: input, shape index: {}]   ;;  %s2303_s6 = inlined_call_operand.vmem [shape: f32[8,1], index: 6, kind: input, shape index: {}]   ;;  %s2304_s5 = inlined_call_operand.vmem [shape: f32[9,8,8], index: 5, kind: input, shape index: {}]   ;;  %s2305_s8 = inlined_call_operand.vmem [shape: f32[8,1], index: 8, kind: input, shape index: {}]   ;;  %s2306_s7 = inlined_call_operand.vmem [shape: f32[8,1], index: 7, kind: input, shape index: {}]   ;;  %s2307_s9 = inlined_call_operand.vmem [shape: f32[8,256], index: 9, kind: output, shape index: {}]  }
   0x1   :  { %v1976_v0 = vld [vmem:[%s2298_s0 + $0x8] sm:$0xff]  ;;  %154 = vmatprep.mubr.f32.mxu0 %v1913_v1  ;;  %1040 = vmatprep.mubr.f32.mxu1 %v1913_v1  ;;  %v1987_v2 = vld [vmem:[%s2298_s0] sm:$0xff]  ;;  %s1916_s15 = smov 15   ;;  %s1917_s16 = smov 1   ;;  %vm73_vm1 = vcmask 130048   ;;  %vm86_vm4 = vcmask 64512  }
   0x2   :  { %48 = vrot.lane.b32.xlu1 %v1976_v0, %s1914_s11  ;;  %68 = vrot.lane.b32.xlu0 %v1976_v0, %s1915_s12  ;;  %s1918_s0 = smov 127   ;;  %s1919_s17 = smov 113   ;;  %v883_v4 = vld [vmem:[%s2299_s2] sm:$0xff]  ;;  %v2020_v6 = vand.u32 127, %v34_v5  ;;  %v1803_v18 = vld [vmem:[%s2300_s1 + $0x8] sm:$0xff]  ;;  %vm240_vm7 = vcmask 121856  }
   0x3   :  { %s1920_s18 = smov 112   ;;  %s1921_s19 = smov 111   ;;  %1907 = vset.pattern.permute.xlu0 %v1922_v3  ;;  %1908 = vset.pattern.permute.xlu1 %v1922_v3  ;;  %vm2309_vm10 = vcmask 7168   ;;  %v67_v29 = vld [vmem:[%s2300_s1] sm:$0xff]  ;;  %v1809_v33 = vld [vmem:[%s2300_s1 + $0x10] sm:$0xff]  ;;  %vm2308_vm12 = vcmask 1039360  }
   0x4   :  { %v2023_v7 = vadd.s32 128, %v2020_v6  ;;  %v37_v8 = vand.u32 15, %v2020_v6  ;;  %vm39_vm3 = vcmp.ge.s32.totalorder %v2020_v6, 16  ;;  %v1813_v37 = vld [vmem:[%s2300_s1 + $0x18] sm:$0xff]  ;;  %vm2310_vm13 = vcmask 924672   ;;  %v1817_v41 = vld [vmem:[%s2300_s1 + $0x20] sm:$0xff] }
   0x5   :  { %v1819_v47 = vld [vmem:[%s2300_s1 + $0x28] sm:$0xff]  ;;  %v1823_v52 = vld [vmem:[%s2300_s1 + $0x30] sm:$0xff]  ;;  %v1827_v56 = vld [vmem:[%s2300_s1 + $0x38] sm:$0xff] }
   0x6   :  { %52 = vrot.lane.b32.xlu1 %v1987_v2, %s1914_s11  ;;  %71 = vrot.lane.b32.xlu0 %v1987_v2, %s1915_s12  ;;  %v38_v11 = vand.u32 15, %v2023_v7  ;;  %vm2027_vm2 = vcmp.ge.s32.totalorder %v37_v8, 1  ;;  %vm2066_vm9 = vcmp.le.s32.totalorder %v37_v8, 14  ;;  %vm42_vm14 = vcmp.lt.s32.totalorder %v2023_v7, 240  ;;  %v1830_v58 = vld [vmem:[%s2300_s1 + $0x40] sm:$0xff]  ;;  %v1844_v31 = vld [vmem:[%s2304_s5 + $0x18] sm:$0xff] }
   0x7   :  { %vm2047_vm6 = vmand %vm39_vm3, %vm2027_vm2  ;;  %v1850_v22 = vld [vmem:[%s2304_s5 + $0x28] sm:$0xff]  ;;  %v1854_v44 = vld [vmem:[%s2304_s5 + $0x30] sm:$0xff] }
   0x8   :  { %vm2038_vm5 = vcmp.ge.s32.totalorder %v38_v11, 1  ;;  %vm2053_vm8 = vcmp.le.s32.totalorder %v38_v11, 14  ;;  %vm2078_vm11 = vmand %vm39_vm3, %vm2066_vm9  ;;  %v1858_v7 = vld [vmem:[%s2304_s5 + $0x38] sm:$0xff] }
   0x9   :  { %vm2117_vm15 = vmand %vm42_vm14, %vm2038_vm5 }
   0xa   :  { %238 = vrot.lane.b32.xlu1 %v1987_v2, %s1916_s15  ;;  %235 = vrot.lane.b32.xlu0 %v1976_v0, %s1916_s15 }
   0xe   :  { %334 = vrot.lane.b32.xlu1 %v1987_v2, %s1917_s16  ;;  %331 = vrot.lane.b32.xlu0 %v1976_v0, %s1917_s16 }
  0x12   :  { %505 = vrot.lane.b32.xlu1 %v1976_v0, %s1918_s0  ;;  %503 = vrot.lane.b32.xlu0 %v1987_v2, %s1918_s0 }
  0x16   :  { %599 = vrot.lane.b32.xlu1 %v1976_v0, %s1919_s17  ;;  %597 = vrot.lane.b32.xlu0 %v1987_v2, %s1919_s17 }
  0x1a   :  { %695 = vrot.lane.b32.xlu1 %v1976_v0, %s1920_s18  ;;  %693 = vrot.lane.b32.xlu0 %v1987_v2, %s1920_s18 }
  0x1e   :  { %789 = vrot.lane.b32.xlu1 %v1976_v0, %s1921_s19  ;;  %787 = vrot.lane.b32.xlu0 %v1987_v2, %s1921_s19 }
  0x22   :  { %886 = vperm.xlu0 %1907, %v883_v4  }
  0x74   :  { %v49_v9 = vpop.permute.xlu1 %48  ;;  %v69_v10 = vpop.permute.xlu0 %68 }
  0x78   :  { %v53_v13 = vpop.permute.xlu1 %52  ;;  %v72_v14 = vpop.permute.xlu0 %71 }
  0x79   :  { %v55_v15 = vsel %vm54_vm0, %v53_v13, %v49_v9  ;;  %v74_v16 = vsel %vm73_vm1, %v72_v14, %v69_v10  ;;  %v77_v17 = vsel %vm73_vm1, %v69_v10, %v72_v14  ;;  %v58_v20 = vsel %vm54_vm0, %v49_v9, %v53_v13 }
  0x7a   :  { %90 = vmatprep.subr.mxu0 %v74_v16 }
  0x7b   :  { %1804 = vmatpush1.msk.msra.mxu0 %vm39_vm3, %v77_v17 }
  0x7c   :  { %1805 = vmatmul.mubr.msk.f32.vlgmr.msra.gmra.mrb[0].mxu0 %vm86_vm4, %v1803_v18  ;;  %1806 = vmatprep.subr.msk.mxu0 %vm2038_vm5, %v55_v15  ;;  %v239_v23 = vpop.permute.xlu1 %238  ;;  %v236_v24 = vpop.permute.xlu0 %235 }
  0x7d   :  { %1807 = vmatpush1.msk.msra.mxu0 %vm2047_vm6, %v58_v20  ;;  %228 = vmatprep.mubr.f32.mxu0 %v1913_v1  ;;  %v241_v25 = vsel %vm240_vm7, %v239_v23, %v236_v24  ;;  %v244_v30 = vsel %vm240_vm7, %v236_v24, %v239_v23  ;;  %v936_v20 = vld [vmem:[%s2301_s4] sm:$0xff] }
  0x7e   :  { %1810 = vmatprep.subr.msk.mxu0 %vm2053_vm8, %v241_v25 }
  0x80   :  { %v335_v27 = vpop.permute.xlu1 %334  ;;  %v332_v28 = vpop.permute.xlu0 %331 }
  0x81   :  { %v337_v32 = vsel %vm2309_vm10, %v335_v27, %v332_v28  ;;  %v340_v34 = vsel %vm2309_vm10, %v332_v28, %v335_v27  ;;  %vm2311_vm10 = vcmask 908288  }
  0x84   :  { %1808 = vmatmul.mubr.msk.f32.vlgmr.msra.gmra.mrb[0].mxu0 %vm86_vm4, %v67_v29  ;;  %v506_v35 = vpop.permute.xlu1 %505  ;;  %v504_v36 = vpop.permute.xlu0 %503 }
  0x85   :  { %1811 = vmatpush1.msk.msra.mxu0 %vm2078_vm11, %v244_v30  ;;  %322 = vmatprep.mubr.f32.mxu0 %v1913_v1  ;;  %v512_v38 = vsel %vm2308_vm12, %v506_v35, %v504_v36  ;;  %v508_v42 = vsel %vm2308_vm12, %v504_v36, %v506_v35  ;;  %vm697_vm12 = vcmask 916480  }
  0x86   :  { %1814 = vmatprep.subr.msk.mxu0 %vm2038_vm5, %v337_v32  ;;  %v925_v32 = vld [vmem:[%s2302_s3] sm:$0xff] }
  0x88   :  { %v600_v39 = vpop.permute.xlu1 %599  ;;  %v598_v40 = vpop.permute.xlu0 %597 }
  0x89   :  { %v606_v43 = vsel %vm2310_vm13, %v600_v39, %v598_v40  ;;  %v602_v48 = vsel %vm2310_vm13, %v598_v40, %v600_v39  ;;  %vm2147_vm13 = vmand %vm42_vm14, %vm2053_vm8 }
  0x8c   :  { %1812 = vmatmul.mubr.msk.f32.vlgmr.msra.gmra.mrb[0].mxu0 %vm86_vm4, %v1809_v33  ;;  %v696_v45 = vpop.permute.xlu1 %695  ;;  %v694_v46 = vpop.permute.xlu0 %693 }
  0x8d   :  { %1815 = vmatpush1.msk.msra.mxu0 %vm2027_vm2, %v340_v34  ;;  %416 = vmatprep.mubr.f32.mxu0 %v1913_v1  ;;  %v702_v49 = vsel %vm697_vm12, %v696_v45, %v694_v46  ;;  %v698_v53 = vsel %vm697_vm12, %v694_v46, %v696_v45 }
  0x8e   :  { %430 = vmatprep.subr.mxu0 %v1976_v0 }
  0x90   :  { %v790_v50 = vpop.permute.xlu1 %789  ;;  %v788_v51 = vpop.permute.xlu0 %787 }
  0x91   :  { %v796_v54 = vsel %vm2311_vm10, %v790_v50, %v788_v51  ;;  %v792_v57 = vsel %vm2311_vm10, %v788_v51, %v790_v50  ;;  %vm902_vm10 = vcmask 1043456   ;;  %v1834_v50 = vld [vmem:[%s2304_s5 + $0x8] sm:$0xff] }
  0x94   :  { %1816 = vmatmul.mubr.msk.f32.vlgmr.msra.gmra.mrb[0].mxu0 %vm86_vm4, %v1813_v37 }
  0x95   :  { %431 = vmatpush1.msra.mxu0 %v1987_v2  ;;  %494 = vmatprep.mubr.f32.mxu0 %v1913_v1 }
  0x96   :  { %1820 = vmatprep.subr.msk.mxu0 %vm2053_vm8, %v512_v38 }
  0x9c   :  { %1818 = vmatmul.mubr.msk.f32.vlgmr.msra.gmra.mrb[0].mxu0 %vm86_vm4, %v1817_v41 }
  0x9d   :  { %1821 = vmatpush1.msk.msra.mxu0 %vm2066_vm9, %v508_v42  ;;  %588 = vmatprep.mubr.f32.mxu0 %v1913_v1 }
  0x9e   :  { %1824 = vmatprep.subr.msk.mxu0 %vm2117_vm15, %v606_v43  ;;  %v1733_v43 = vld [vmem:[%s2303_s6] sm:$0xff] }
  0xa1   :  { %v887_v59 = vpop.permute.xlu0 %886 }
  0xa4   :  { %1822 = vmatmul.mubr.msk.f32.vlgmr.msra.gmra.mrb[0].mxu0 %vm86_vm4, %v1819_v47 }
  0xa5   :  { %1825 = vmatpush1.msk.msra.mxu0 %vm2027_vm2, %v602_v48  ;;  %684 = vmatprep.mubr.f32.mxu0 %v1913_v1 }
  0xa6   :  { %1828 = vmatprep.subr.msk.mxu0 %vm42_vm14, %v702_v49 }
  0xac   :  { %1826 = vmatmul.mubr.msk.f32.vlgmr.msra.gmra.mrb[0].mxu0 %vm86_vm4, %v1823_v52 }
  0xad   :  { %715 = vmatpush1.msra.mxu0 %v698_v53  ;;  %778 = vmatprep.mubr.f32.mxu0 %v1913_v1 }
  0xae   :  { %1831 = vmatprep.subr.msk.mxu0 %vm2147_vm13, %v796_v54 }
  0xb4   :  { %1829 = vmatmul.mubr.msk.f32.vlgmr.msra.gmra.mrb[0].mxu0 %vm86_vm4, %v1827_v56 }
  0xb5   :  { %1832 = vmatpush1.msk.msra.mxu0 %vm2066_vm9, %v792_v57  ;;  %874 = vmatprep.mubr.f32.mxu0 %v1913_v1  ;;  %v959_v57 = vld [vmem:[%s2304_s5] sm:$0xff] }
  0xbc   :  { %1833 = vmatmul.mubr.msk.f32.vlgmr.msra.gmra.mrb[0].mxu0 %vm86_vm4, %v1830_v58 }
 0x18f   :  { %v876_v60 = vpop.f32.mrb[0].mxu0 }
 0x190   :  { %v889_v61 = vadd.f32 %v887_v59, %v876_v60  ;;  %v878_v62 = vpop.f32.mrb[1].mxu0 }
 0x191   :  { %v890_v63 = vadd.f32 %v887_v59, %v878_v62 }
 0x193   :  { %v891_v3 = vadd.f32 %v890_v63, %v889_v61 }
 0x195   :  { %892 = vadd.xlane.f32.xlu1 %v891_v3 }
 0x222   :  { %v893_v4 = vpop.xlane.xlu1 %892 }
 0x223   :  { %v895_v5 = vrot.slane %v893_v4, 4 }
 0x225   :  { %v897_v8 = vadd.f32 %v895_v5, %v893_v4  ;;  %v1848_v4 = vld [vmem:[%s2304_s5 + $0x20] sm:$0xff] }
 0x227   :  { %v898_v9 = vmul.f32 0.001953125, %v897_v8 }
 0x229   :  { %v900_v10 = vrot.slane %v898_v9, 4 }
 0x22b   :  { %v903_v11 = vsel %vm902_vm10, %v898_v9, %v900_v10 }
 0x22c   :  { %906 = vperm.xlu0 %1907, %v903_v11  }
 0x2ab   :  { %v907_v13 = vpop.permute.xlu0 %906 }
 0x2ac   :  { %v909_v14 = vsub.f32 %v889_v61, %v907_v13  ;;  %v910_v15 = vsub.f32 %v890_v63, %v907_v13  ;;  %v1840_v61 = vld [vmem:[%s2304_s5 + $0x10] sm:$0xff] }
 0x2ae   :  { %v911_v16 = vmul.f32 %v909_v14, %v909_v14  ;;  %v912_v17 = vmul.f32 %v910_v15, %v910_v15 }
 0x2b0   :  { %v913_v18 = vadd.f32 %v912_v17, %v911_v16 }
 0x2b2   :  { %914 = vadd.xlane.f32.xlu0 %v913_v18 }
 0x2c8   :  { %939 = vperm.xlu0 %1907, %v936_v20  }
 0x33f   :  { %v915_v23 = vpop.xlane.xlu0 %914 }
 0x340   :  { %v917_v24 = vrot.slane %v915_v23, 4 }
 0x342   :  { %v919_v25 = vadd.f32 %v917_v24, %v915_v23  ;;  %v1861_v23 = vld [vmem:[%s2304_s5 + $0x40] sm:$0xff] }
 0x344   :  { %v920_v27 = vmul.f32 0.001953125, %v919_v25 }
 0x346   :  { %v922_v28 = vrot.slane %v920_v27, 4 }
 0x347   :  { %v940_v38 = vpop.permute.xlu0 %939 }
 0x348   :  { %v924_v29 = vsel %vm902_vm10, %v920_v27, %v922_v28 }
 0x349   :  { %v926_v30 = vadd.f32 1e-05, %v924_v29 }
 0x34b   :  { %1909 = vrsqrt.f32 %v926_v30 }
 0x355   :  { %v1910_v33 = vpop.eup %1909 }
 0x356   :  { %v928_v34 = vmul.f32 %v1910_v33, %v925_v32 }
 0x358   :  { %931 = vperm.xlu1 %1908, %v928_v34  }
 0x3d7   :  { %v932_v35 = vpop.permute.xlu1 %931 }
 0x3d8   :  { %v934_v36 = vmul.f32 %v932_v35, %v909_v14  ;;  %v935_v37 = vmul.f32 %v932_v35, %v910_v15 }
 0x3da   :  { %v942_v39 = vadd.f32 %v940_v38, %v934_v36  ;;  %v943_v40 = vadd.f32 %v940_v38, %v935_v37 }
 0x3dc   :  { %v944_v41 = vmax.f32 %v942_v39, 0.0  ;;  %v945_v42 = vmax.f32 %v943_v40, 0.0 }
 0x3de   :  { %960 = vrot.lane.b32.xlu1 %v945_v42, %s1915_s12  ;;  %951 = vrot.lane.b32.xlu0 %v944_v41, %s1914_s11 }
 0x3e2   :  { %1124 = vrot.lane.b32.xlu0 %v944_v41, %s1916_s15  ;;  %963 = vrot.lane.b32.xlu1 %v944_v41, %s1915_s12 }
 0x3e6   :  { %1213 = vrot.lane.b32.xlu0 %v944_v41, %s1917_s16  ;;  %947 = vrot.lane.b32.xlu1 %v945_v42, %s1914_s11 }
 0x3ea   :  { %1379 = vrot.lane.b32.xlu0 %v945_v42, %s1918_s0  ;;  %1121 = vrot.lane.b32.xlu1 %v945_v42, %s1916_s15 }
 0x3ee   :  { %1468 = vrot.lane.b32.xlu0 %v945_v42, %s1919_s17  ;;  %1210 = vrot.lane.b32.xlu1 %v945_v42, %s1917_s16 }
 0x3f2   :  { %1557 = vrot.lane.b32.xlu0 %v945_v42, %s1920_s18  ;;  %1377 = vrot.lane.b32.xlu1 %v944_v41, %s1918_s0 }
 0x3f6   :  { %1646 = vrot.lane.b32.xlu0 %v945_v42, %s1921_s19  ;;  %1466 = vrot.lane.b32.xlu1 %v944_v41, %s1919_s17 }
 0x3fa   :  { %1555 = vrot.lane.b32.xlu1 %v944_v41, %s1920_s18 }
 0x3fe   :  { %1644 = vrot.lane.b32.xlu1 %v944_v41, %s1921_s19 }
 0x402   :  { %1736 = vperm.xlu1 %1908, %v1733_v43  }
 0x450   :  { %v961_v45 = vpop.permute.xlu1 %960  ;;  %v952_v46 = vpop.permute.xlu0 %951 }
 0x454   :  { %v964_v47 = vpop.permute.xlu1 %963  ;;  %v1125_v54 = vpop.permute.xlu0 %1124 }
 0x455   :  { %v965_v48 = vsel %vm73_vm1, %v964_v47, %v961_v45  ;;  %v968_v49 = vsel %vm73_vm1, %v961_v45, %v964_v47 }
 0x456   :  { %976 = vmatprep.subr.mxu1 %v965_v48 }
 0x457   :  { %1835 = vmatpush1.msk.msra.mxu1 %vm39_vm3, %v968_v49  ;;  %vm2330_vm3 = vcmask 1039360  }
 0x458   :  { %1836 = vmatmul.mubr.msk.f32.vlgmr.msra.gmra.mrb[0].mxu1 %vm86_vm4, %v1834_v50  ;;  %v948_v51 = vpop.permute.xlu1 %947  ;;  %v1214_v58 = vpop.permute.xlu0 %1213  ;;  %v1774_v50 = vld [vmem:[%s2306_s7] sm:$0xff] }
 0x459   :  { %v953_v52 = vsel %vm54_vm0, %v952_v46, %v948_v51  ;;  %v956_v53 = vsel %vm54_vm0, %v948_v51, %v952_v46  ;;  %1114 = vmatprep.mubr.f32.mxu1 %v1913_v1  ;;  %vm2328_vm0 = vcmask 7168  }
 0x45a   :  { %1837 = vmatprep.subr.msk.mxu1 %vm2038_vm5, %v953_v52  ;;  %vm2329_vm1 = vmmov %vm2328_vm0 }
 0x45b   :  { %1838 = vmatpush1.msk.msra.mxu1 %vm2047_vm6, %v956_v53  ;;  %vm2332_vm6 = vcmask 924672  }
 0x45c   :  { %v1122_v56 = vpop.permute.xlu1 %1121  ;;  %v1380_v63 = vpop.permute.xlu0 %1379 }
 0x45d   :  { %v1126_v6 = vsel %vm240_vm7, %v1125_v54, %v1122_v56  ;;  %v1129_v59 = vsel %vm240_vm7, %v1122_v56, %v1125_v54  ;;  %vm2333_vm7 = vmmov %vm2332_vm6 }
 0x45e   :  { %1841 = vmatprep.subr.msk.mxu1 %vm2053_vm8, %v1126_v6 }
 0x460   :  { %1839 = vmatmul.mubr.msk.f32.vlgmr.msra.gmra.mrb[0].mxu1 %vm86_vm4, %v959_v57  ;;  %v1211_v60 = vpop.permute.xlu1 %1210  ;;  %v1469_v8 = vpop.permute.xlu0 %1468 }
 0x461   :  { %1842 = vmatpush1.msk.msra.mxu1 %vm2078_vm11, %v1129_v59  ;;  %v1215_v21 = vsel %vm2328_vm0, %v1214_v58, %v1211_v60  ;;  %1201 = vmatprep.mubr.f32.mxu1 %v1913_v1  ;;  %v1218_v62 = vsel %vm2329_vm1, %v1211_v60, %v1214_v58 }
 0x462   :  { %1845 = vmatprep.subr.msk.mxu1 %vm2038_vm5, %v1215_v21  ;;  %vm2331_vm5 = vmmov %vm2330_vm3 }
 0x464   :  { %v1378_v19 = vpop.permute.xlu1 %1377  ;;  %v1558_v13 = vpop.permute.xlu0 %1557 }
 0x465   :  { %v1385_v3 = vsel %vm2330_vm3, %v1380_v63, %v1378_v19  ;;  %v1381_v9 = vsel %vm2331_vm5, %v1378_v19, %v1380_v63 }
 0x468   :  { %1843 = vmatmul.mubr.msk.f32.vlgmr.msra.gmra.mrb[0].mxu1 %vm86_vm4, %v1840_v61  ;;  %v1467_v5 = vpop.permute.xlu1 %1466  ;;  %v1647_v17 = vpop.permute.xlu0 %1646 }
 0x469   :  { %1846 = vmatpush1.msk.msra.mxu1 %vm2027_vm2, %v1218_v62  ;;  %1290 = vmatprep.mubr.f32.mxu1 %v1913_v1  ;;  %v1474_v10 = vsel %vm2332_vm6, %v1469_v8, %v1467_v5  ;;  %v1470_v14 = vsel %vm2333_vm7, %v1467_v5, %v1469_v8 }
 0x46a   :  { %1304 = vmatprep.subr.mxu1 %v945_v42 }
 0x46c   :  { %v1556_v11 = vpop.permute.xlu1 %1555 }
 0x46d   :  { %v1563_v15 = vsel %vm697_vm12, %v1558_v13, %v1556_v11  ;;  %v1559_v18 = vsel %vm697_vm12, %v1556_v11, %v1558_v13 }
 0x470   :  { %1847 = vmatmul.mubr.msk.f32.vlgmr.msra.gmra.mrb[0].mxu1 %vm86_vm4, %v1844_v31  ;;  %v1645_v16 = vpop.permute.xlu1 %1644 }
 0x471   :  { %1305 = vmatpush1.msra.mxu1 %v944_v41  ;;  %1368 = vmatprep.mubr.f32.mxu1 %v1913_v1  ;;  %v1785_v41 = vld [vmem:[%s2305_s8] sm:$0xff] }
 0x472   :  { %1851 = vmatprep.subr.msk.mxu1 %vm2053_vm8, %v1385_v3  ;;  %vm2334_vm8 = vcmask 908288  }
 0x473   :  { %v1652_v20 = vsel %vm2334_vm8, %v1647_v17, %v1645_v16 }
 0x478   :  { %1849 = vmatmul.mubr.msk.f32.vlgmr.msra.gmra.mrb[0].mxu1 %vm86_vm4, %v1848_v4 }
 0x479   :  { %1852 = vmatpush1.msk.msra.mxu1 %vm2066_vm9, %v1381_v9  ;;  %1457 = vmatprep.mubr.f32.mxu1 %v1913_v1 }
 0x47a   :  { %1855 = vmatprep.subr.msk.mxu1 %vm2117_vm15, %v1474_v10 }
 0x480   :  { %1853 = vmatmul.mubr.msk.f32.vlgmr.msra.gmra.mrb[0].mxu1 %vm86_vm4, %v1850_v22 }
 0x481   :  { %1856 = vmatpush1.msk.msra.mxu1 %vm2027_vm2, %v1470_v14  ;;  %1546 = vmatprep.mubr.f32.mxu1 %v1913_v1  ;;  %vm2335_vm2 = vmmov %vm2334_vm8  ;;  %v1737_v55 = vpop.permute.xlu1 %1736 }
 0x482   :  { %1859 = vmatprep.subr.msk.mxu1 %vm42_vm14, %v1563_v15  ;;  %v1648_v12 = vsel %vm2335_vm2, %v1645_v16, %v1647_v17 }
 0x488   :  { %1857 = vmatmul.mubr.msk.f32.vlgmr.msra.gmra.mrb[0].mxu1 %vm86_vm4, %v1854_v44 }
 0x489   :  { %1572 = vmatpush1.msra.mxu1 %v1559_v18  ;;  %1635 = vmatprep.mubr.f32.mxu1 %v1913_v1 }
 0x48a   :  { %1862 = vmatprep.subr.msk.mxu1 %vm2147_vm13, %v1652_v20 }
 0x490   :  { %1860 = vmatmul.mubr.msk.f32.vlgmr.msra.gmra.mrb[0].mxu1 %vm86_vm4, %v1858_v7 }
 0x491   :  { %1863 = vmatpush1.msk.msra.mxu1 %vm2066_vm9, %v1648_v12  ;;  %1724 = vmatprep.mubr.f32.mxu1 %v1913_v1 }
 0x498   :  { %1864 = vmatmul.mubr.msk.f32.vlgmr.msra.gmra.mrb[0].mxu1 %vm86_vm4, %v1861_v23 }
 0x56b   :  { %v1726_v24 = vpop.f32.mrb[0].mxu1 }
 0x56c   :  { %v1739_v25 = vadd.f32 %v1737_v55, %v1726_v24  ;;  %v1728_v27 = vpop.f32.mrb[1].mxu1 }
 0x56d   :  { %v1740_v28 = vadd.f32 %v1737_v55, %v1728_v27 }
 0x56f   :  { %v1741_v29 = vadd.f32 %v1740_v28, %v1739_v25 }
 0x571   :  { %1742 = vadd.xlane.f32.xlu0 %v1741_v29 }
 0x5fe   :  { %v1743_v30 = vpop.xlane.xlu0 %1742 }
 0x5ff   :  { %v1745_v32 = vrot.slane %v1743_v30, 4 }
 0x601   :  { %v1747_v33 = vadd.f32 %v1745_v32, %v1743_v30 }
 0x603   :  { %v1748_v26 = vmul.f32 0.001953125, %v1747_v33 }
 0x605   :  { %v1750_v34 = vrot.slane %v1748_v26, 4 }
 0x607   :  { %v1752_v1 = vsel %vm902_vm10, %v1748_v26, %v1750_v34 }
 0x608   :  { %1755 = vperm.xlu1 %1908, %v1752_v1  }
 0x687   :  { %v1756_v35 = vpop.permute.xlu1 %1755 }
 0x688   :  { %v1758_v36 = vsub.f32 %v1739_v25, %v1756_v35  ;;  %v1759_v37 = vsub.f32 %v1740_v28, %v1756_v35 }
 0x68a   :  { %v1760_v38 = vmul.f32 %v1758_v36, %v1758_v36  ;;  %v1761_v39 = vmul.f32 %v1759_v37, %v1759_v37 }
 0x68c   :  { %v1762_v40 = vadd.f32 %v1761_v39, %v1760_v38 }
 0x68e   :  { %1763 = vadd.xlane.f32.xlu1 %v1762_v40 }
 0x69f   :  { %1788 = vperm.xlu1 %1908, %v1785_v41  }
 0x71b   :  { %v1764_v42 = vpop.xlane.xlu1 %1763 }
 0x71c   :  { %v1766_v43 = vrot.slane %v1764_v42, 4 }
 0x71e   :  { %v1768_v45 = vadd.f32 %v1766_v43, %v1764_v42 }
 0x71f   :  { %v1789_v6 = vpop.permute.xlu1 %1788 }
 0x720   :  { %v1769_v46 = vmul.f32 0.001953125, %v1768_v45 }
 0x722   :  { %v1771_v47 = vrot.slane %v1769_v46, 4 }
 0x724   :  { %v1773_v48 = vsel %vm902_vm10, %v1769_v46, %v1771_v47 }
 0x725   :  { %v1775_v49 = vadd.f32 1e-05, %v1773_v48 }
 0x727   :  { %1911 = vrsqrt.f32 %v1775_v49 }
 0x731   :  { %v1912_v51 = vpop.eup %1911 }
 0x732   :  { %v1777_v52 = vmul.f32 %v1912_v51, %v1774_v50 }
 0x734   :  { %1780 = vperm.xlu0 %1907, %v1777_v52  }
 0x7b3   :  { %v1781_v53 = vpop.permute.xlu0 %1780 }
 0x7b4   :  { %v1783_v54 = vmul.f32 %v1781_v53, %v1758_v36  ;;  %v1784_v56 = vmul.f32 %v1781_v53, %v1759_v37 }
 0x7b6   :  { %v1791_v57 = vadd.f32 %v1789_v6, %v1783_v54  ;;  %v1792_v58 = vadd.f32 %v1789_v6, %v1784_v56 }
 0x7b8   :  { %v1793_v59 = vadd.f32 %v1791_v57, %v1987_v2  ;;  %v1794_v60 = vadd.f32 %v1792_v58, %v1976_v0 }
 0x7ba   :  { %v1795_v21 = vmax.f32 %v1793_v59, 0.0  ;;  %v1796_v61 = vmax.f32 %v1794_v60, 0.0 }
 0x7bc   :  { %1797 = vst [vmem:[%s2307_s9] sm:$0xff] %v1795_v21  ;;  %1798 = vst [vmem:[%s2307_s9 + $0x8] sm:$0xff] %v1796_v61 }

</bundles_post_ra>
